<compile_context>
chip_gen: v6e
topology: v6e:2x2x1
jax: 0.10.0
libtpu: 0.0.40
codegen_flags: <defaults>
</compile_context>

<pallas_src>
import functools

import jax
import jax.numpy as jnp
from jax.experimental import pallas as pl
from jax.experimental.pallas import tpu as pltpu


# ~2 MiB per block: with double-buffered input + output (4 buffers) that is
# ~8 MiB of VMEM, comfortably inside every generation's scoped default while
# large enough to amortize the ~0.35 us per-grid-step overhead (>=85% of HBM
# roofline per the measured tiled-copy data).
_TARGET_BLOCK_BYTES = 2 * 1024 * 1024

# Inputs smaller than this are returned as-is: fixed pallas_call launch +
# DMA overhead would dominate the copy by orders of magnitude.
_MIN_PALLAS_BYTES = 1 << 20


def _min_sublanes(itemsize: int) -> int:
    """Dtype-aware minimum row (sublane) tile: packed dtypes need 16/32 rows."""
    if itemsize >= 4:
        return 8
    if itemsize == 2:
        return 16
    return 32


def _hookpoint_kernel(x_ref, o_ref):
    # Identity: copy the current (rows, lanes) tile from input VMEM to output.
    o_ref[...] = x_ref[...]


def _lane_dense_2d(x):
    """Flatten x to a 2-D (rows, lanes) slab with a lane-dense last dim.

    The logical shape is irrelevant to an identity copy, so when the element
    count allows we present a wide multiple-of-128 lane dimension (unmasked
    full-width stores).  Otherwise fall back to (prod(leading), last_dim),
    which is still legal as a full-extent last-dim block.
    """
    total = int(x.size)
    for lanes in (1024, 512, 256, 128):
        if total % lanes == 0:
            return x.reshape(total // lanes, lanes)
    d = x.shape[-1] if x.ndim >= 1 else 1
    d = max(int(d), 1)
    return x.reshape(total // d, d)


@functools.partial(jax.jit)
def _identity_copy_2d(x2):
    """Tiled, pipelined HBM->VMEM->HBM identity copy of a 2-D slab."""
    n_rows, lanes = x2.shape
    itemsize = x2.dtype.itemsize
    min_rows = _min_sublanes(itemsize)

    # Byte-budgeted row tile, rounded down to the dtype-aware sublane multiple.
    rows = _TARGET_BLOCK_BYTES // (lanes * itemsize)
    rows = max(min_rows, (rows // min_rows) * min_rows)
    if rows >= n_rows:
        # Single full-extent block along rows (always a legal block shape).
        rows = n_rows

    grid = (pl.cdiv(n_rows, rows),)
    block = (rows, lanes)

    return pl.pallas_call(
        _hookpoint_kernel,
        out_shape=jax.ShapeDtypeStruct((n_rows, lanes), x2.dtype),
        grid=grid,
        in_specs=[pl.BlockSpec(block, lambda i: (i, 0))],
        out_specs=pl.BlockSpec(block, lambda i: (i, 0)),
        # No new HBM buffer when the input can be donated / is an intermediate
        # inside a larger jit; XLA falls back to one defensive copy otherwise.
        input_output_aliases={0: 0},
        cost_estimate=pl.CostEstimate(
            flops=0,
            transcendentals=0,
            bytes_accessed=2 * n_rows * lanes * itemsize),
        compiler_params=pltpu.CompilerParams(
            # NOTE: on v7x, pltpu.CORE_PARALLEL would shard the row-tile axis
            # across both TensorCores; "parallel" is kept for portability.
            dimension_semantics=("parallel",)),
    )(x2)


def hookpoint_forward(x, *, min_pallas_bytes=_MIN_PALLAS_BYTES):
    """Identity forward of HookPoint.

    For small inputs (or whenever only the hook-anchor semantics are needed)
    this returns `x` directly -- the fastest correct implementation of an
    identity.  Larger inputs are streamed through a tiled, lane-dense Pallas
    copy whose output aliases its input.
    """
    nbytes = int(x.size) * x.dtype.itemsize
    if x.size == 0 or nbytes < min_pallas_bytes:
        return x

    x2 = _lane_dense_2d(x)
    out2 = _identity_copy_2d(x2)
    return out2.reshape(x.shape)


if __name__ == "__main__":
    key = jax.random.PRNGKey(0)
    k1, k2, k3 = jax.random.split(key, 3)

    # (batch, positions, d_model) residual-stream activations, as in learnCOT.
    x = jax.random.normal(k1, (2, 8, 128), jnp.float32)

    # 1) Default path: tiny input -> bypass, no device copy at all.
    out = jax.block_until_ready(hookpoint_forward(x))
    assert out.shape == x.shape and out.dtype == x.dtype
    assert jnp.array_equal(out, x), "HookPoint forward must be the identity"

    # 2) Force the Pallas kernel on the same small activation (single block,
    #    lane-dense (2, 1024) slab).
    out = jax.block_until_ready(hookpoint_forward(x, min_pallas_bytes=0))
    assert out.shape == x.shape and out.dtype == x.dtype
    assert jnp.array_equal(out, x), "Pallas identity kernel mismatch"

    # 3) Larger activation: exercises the byte-budgeted tiling, the pipelined
    #    multi-step grid, and a ragged tail block (1250 rows / 512-row tiles).
    y = jax.random.normal(k2, (10, 1000, 128), jnp.float32)
    out_y = jax.block_until_ready(hookpoint_forward(y))
    assert out_y.shape == y.shape and out_y.dtype == y.dtype
    assert jnp.array_equal(out_y, y), "Pallas identity kernel mismatch (large)"

    # 4) bf16 activation: exercises the dtype-aware (16-sublane) minimum tile.
    z = jax.random.normal(k3, (3, 1000, 128), jnp.float32).astype(jnp.bfloat16)
    out_z = jax.block_until_ready(hookpoint_forward(z, min_pallas_bytes=0))
    assert out_z.shape == z.shape and out_z.dtype == z.dtype
    assert jnp.array_equal(out_z, z), "Pallas identity kernel mismatch (bf16)"

    # TODO(synk): add_hook / remove_hooks (PyTorch forward/backward hook
    # registration and removal) are host-side Python state with no device
    # compute and no Pallas equivalent; only the identity forward is lowered.

    print("KERNEL_OK")
</pallas_src>

<mosaic_0001>
module attributes {stable_mosaic.version = 11 : i64} {
  func.func @_hookpoint_kernel(%arg0: i32, %arg1: memref<2x1024xf32, #tpu.memory_space<vmem>>, %arg2: memref<2x1024xf32, #tpu.memory_space<vmem>>) attributes {dimension_semantics = [#tpu.dimension_semantics<parallel>], iteration_bounds = array<i64: 1>, scalar_prefetch = 0 : i64, scratch_operands = 0 : i64, tpu.core_type = #tpu.core_type<tc>, window_params = [{transform_indices = @transform_0, window_bounds = array<i64: 2, 1024>}, {transform_indices = @transform_1, window_bounds = array<i64: 2, 1024>}]} {
    %c0 = arith.constant 0 : index
    %c0_0 = arith.constant 0 : index
    %0 = vector.load %arg1[%c0, %c0_0] : memref<2x1024xf32, #tpu.memory_space<vmem>>, vector<2x1024xf32>
    %c0_1 = arith.constant 0 : index
    %c0_2 = arith.constant 0 : index
    %1 = vector.load %arg2[%c0_1, %c0_2] : memref<2x1024xf32, #tpu.memory_space<vmem>>, vector<2x1024xf32>
    tpu.vector_store %arg2[%c0_1, %c0_2], %0 {strides = array<i32>} : memref<2x1024xf32, #tpu.memory_space<vmem>>, vector<2x1024xf32>,
    return
  }
  func.func @transform_0(%arg0: i32) -> (i32, i32) {
    %c0_i32 = arith.constant 0 : i32
    %c0_i32_0 = arith.constant 0 : i32
    return %arg0, %c0_i32 : i32, i32
  }
  func.func @transform_1(%arg0: i32) -> (i32, i32) {
    %c0_i32 = arith.constant 0 : i32
    %c0_i32_0 = arith.constant 0 : i32
    return %arg0, %c0_i32 : i32, i32
  }
}

</mosaic_0001>

<bundles_post_ra>
// kernel: _identity_copy_2d.1
= control target key start
LH: loop header
LB: loop body
LE: loop exit
PB: predicated region body
PF: predicated region fallthrough
CT: control target
= control target key end

     0   :  { %6 = vsyncpa [#allocation3], 0  ;;  %s104_s0 = inlined_call_operand.hbm [shape: f32[2,1024], index: 0, kind: input, shape index: {}, may-alias: {0,1}]   ;;  %s105_s1 = inlined_call_operand.hbm [shape: f32[2,1024], index: 1, kind: output, shape index: {}, may-alias: {0,1}]  }
   0x1   :  { %7 = vsyncpa [#allocation4], 0  ;;  %s86_s6 = smov [#allocation2]  }
   0x2   :  { %s14_s7 = sshll.u32 %s86_s6, 4  ;;  %s15_s7 = int_to_ptr.vmem [resolvable:$true] %s14_s7 }
   0x3   :  { %s50_s8 = scalar_lea.vmem %s15_s7, 256  ;;  %p55_p1 = scmp.lt.s32.totalorder %s15_s7, %s15_s7 }
   0x4   :  { %p51_p0 = scmp.ne.s32.totalorder %s15_s7, %s50_s8  ;;  %p56_p2 = scmp.lt.s32.totalorder %s50_s8, %s50_s8 }
   0x6   :  { %p57_p3 = por %p56_p2, %p55_p1 }
   0x8   :  { %p58_p4 = pnand %p57_p3, %p51_p0 }
   0xa   :  { %61 = shalt.err (!%p58_p4)
}
   0xb   :  { %17 = dma.hbm_to_vmem [thread:$0]  %s104_s0, 256, %s15_s7, [#allocation3]  }
   0xc   :  { %82 = dma.done.wait [#allocation3], 256  }
   0xd   :  { %83 = vsyncadd [#allocation3], 4294967040  ;;  %s87_s11 = smov [#allocation5]   ;;  %v21_v0 = vld [vmem:[#allocation2] sm:$0xff]  ;;  %v22_v1 = vld [vmem:[#allocation2 + $0x8] sm:$0xff] }
   0xe   :  { %s31_s12 = sshll.u32 %s87_s11, 4  ;;  %23 = vst [vmem:[#allocation5] sm:$0xff] %v21_v0  ;;  %24 = vst [vmem:[#allocation5 + $0x8] sm:$0xff] %v22_v1  ;;  %s32_s12 = int_to_ptr.vmem [resolvable:$true] %s31_s12 }
   0xf   :  { %s62_s13 = scalar_lea.vmem %s32_s12, 256  ;;  %p67_p6 = scmp.lt.s32.totalorder %s32_s12, %s32_s12 }
  0x10   :  { %p63_p5 = scmp.ne.s32.totalorder %s32_s12, %s62_s13  ;;  %p68_p7 = scmp.lt.s32.totalorder %s62_s13, %s62_s13 }
  0x12   :  { %p69_p8 = por %p68_p7, %p67_p6 }
  0x14   :  { %p70_p9 = pnand %p69_p8, %p63_p5 }
  0x16   :  { %73 = shalt.err (!%p70_p9)
}
  0x17   :  { %34 = dma.vmem_to_hbm [thread:$0]  %s32_s12, 256, %s105_s1, [#allocation4]  }
  0x18   :  { %84 = dma.done.wait [#allocation4], 256  }
  0x19   :  { %85 = vsyncadd [#allocation4], 4294967040 }
  0x1a   :  { %38 = vsyncpa [#allocation3], 1 }
  0x1b   :  { %39 = vsyncpa [#allocation4], 1 }

</bundles_post_ra>
